<compile_context>
chip_gen: v7x
topology: tpu7x:2x2x1
jax: 0.10.0
libtpu: 0.0.40
codegen_flags: <defaults>
</compile_context>

<pallas_src>
import functools
from typing import NamedTuple, Optional, Sequence, Tuple

import jax
import jax.numpy as jnp
from jax.experimental import pallas as pl
from jax.experimental.pallas import tpu as pltpu

LEAKY_SLOPE = 0.01   # torch.nn.LeakyReLU default negative_slope
LANE = 128           # TPU lane width: hidden feature dims padded to this
SUBLANE = 8          # sublane width: batch tile rounded to a multiple of this

# Whether pipeline_mode=pl.Buffered(1) on resident weights is supported by the
# installed JAX/Mosaic; discovered on first call, cached afterwards.
_SINGLE_BUFFER_WEIGHTS_OK: Optional[bool] = None


def _round_up(x: int, m: int) -> int:
    return ((x + m - 1) // m) * m


def _cdiv(a: int, b: int) -> int:
    return (a + b - 1) // b


class PreppedEncoder(NamedTuple):
    weights: Tuple[jax.Array, ...]   # bf16, zero-padded to kernel widths
    biases: Tuple[jax.Array, ...]    # f32 (1, out_width), empty if no bias
    dims_io: Tuple[int, ...]         # per-stage kernel feature widths
    n_features: int
    size_z: int
    use_bias: bool


def prepare_encoder_params(params, n_features: int, size_z: int, use_bias: bool) -> PreppedEncoder:
    """One-time parameter prep (do NOT call per forward).

    Hidden feature dims are padded to multiples of LANE (lane-dense MXU tiles);
    the first layer's input dim stays n_features (matches the unpadded x) and
    the last layer's output dim stays size_z (output written at true width).
    """
    n_layers = len(params)
    dims = [n_features] + [w.shape[1] for w, _ in params]
    dims_io = [n_features] + [_round_up(d, LANE) for d in dims[1:-1]] + [size_z]

    weights, biases = [], []
    for li, (w, b) in enumerate(params):
        in_io, out_io = dims_io[li], dims_io[li + 1]
        w_pad = jnp.zeros((in_io, out_io), jnp.bfloat16)
        w_pad = w_pad.at[: w.shape[0], : w.shape[1]].set(w.astype(jnp.bfloat16))
        weights.append(w_pad)
        if use_bias:
            b_pad = jnp.zeros((1, out_io), jnp.float32)
            b_pad = b_pad.at[0, : b.shape[0]].set(b.astype(jnp.float32))
            biases.append(b_pad)
    return PreppedEncoder(tuple(weights), tuple(biases), tuple(dims_io),
                          n_features, size_z, use_bias)


def _encoder_kernel(n_layers: int, use_bias: bool, *refs):
    """Fused MLP over one (tile_b, n_features) activation block.

    refs layout: x_ref, (w1, [b1]), ..., (wL, [bL]), o_ref
    """
    x_ref = refs[0]
    o_ref = refs[-1]
    param_refs = refs[1:-1]
    per_layer = 2 if use_bias else 1

    h = x_ref[...].astype(jnp.bfloat16)                  # cast to bf16 in-kernel (VPU)
    for layer in range(n_layers):
        w = param_refs[layer * per_layer][...]           # bf16 (in_io, out_io)
        acc = jnp.dot(h, w, preferred_element_type=jnp.float32)
        if use_bias:
            acc = acc + param_refs[layer * per_layer + 1][...]   # (1, out) f32
        if layer < n_layers - 1:
            acc = jnp.maximum(acc, LEAKY_SLOPE * acc)    # LeakyReLU in f32
            h = acc.astype(jnp.bfloat16)                 # back to bf16 for MXU
        else:
            h = acc
    # TODO(synk): if layers become MXU-bound with large tile_b, split the tile
    # into two sub-tiles here so one sub-tile's matmul overlaps the other's
    # bias/LeakyReLU/cast epilogue.
    o_ref[...] = h.astype(o_ref.dtype)


def _vmem_limit_bytes() -> int:
    """Generation-aware VMEM request: ~85% of physical capacity."""
    cap = 64 << 20  # conservative fallback (safe on every generation)
    try:
        info = pltpu.get_tpu_info()
        cap = int(getattr(info, "vmem_capacity_bytes", cap) or cap)
    except Exception:
        pass
    return int(cap * 0.85)


def _derive_tile_b(batch: int, dims_io, resident_bytes: int, vmem_limit: int) -> int:
    """Balanced batch tile, >=2 grid steps when possible, VMEM-aware."""
    # Balance tiles around a ~512-row target; keep >=2 steps so the "parallel"
    # grid axis actually spans both TensorCores on v7x (no-op on v5e/v6e).
    num_tiles = _cdiv(batch, 512)
    if batch >= 2 * SUBLANE:
        num_tiles = max(num_tiles, 2)
    tile_b = _round_up(_cdiv(batch, num_tiles), SUBLANE)

    # Shrink tile_b if (conservatively double-buffered) weights + activations
    # would overflow the VMEM budget (matters on v7x's 64 MiB).
    per_row = (2 * dims_io[0] * 4           # x block (f32, double-buffered)
               + 2 * dims_io[-1] * 4        # out block (f32, double-buffered)
               + sum(dims_io[1:]) * 6       # live f32/bf16 intermediates (rough)
               + 64)
    avail = vmem_limit - 2 * resident_bytes
    if avail <= 0:
        return SUBLANE
    max_rows = max(SUBLANE, (avail // per_row) // SUBLANE * SUBLANE)
    return max(SUBLANE, min(tile_b, max_rows))


def _resident_spec(shape, single_buffer: bool) -> pl.BlockSpec:
    """Whole-array, VMEM-resident block (constant index_map)."""
    idx = lambda i: (0, 0)
    if single_buffer:
        # Constant block gains nothing from double buffering; halve its VMEM.
        return pl.BlockSpec(shape, idx, pipeline_mode=pl.Buffered(1))
    return pl.BlockSpec(shape, idx)


def encoder_forward(x, prepped: PreppedEncoder, *, tile_b: Optional[int] = None):
    """Run the fused encoder kernel. x: (batch, n_features) float32."""
    global _SINGLE_BUFFER_WEIGHTS_OK

    batch, n_features = x.shape
    assert n_features == prepped.n_features, (n_features, prepped.n_features)
    n_layers = len(prepped.weights)
    dims_io = prepped.dims_io
    use_bias = prepped.use_bias

    vmem_limit = _vmem_limit_bytes()
    resident_bytes = sum(int(w.size) * 2 for w in prepped.weights)
    resident_bytes += sum(int(b.size) * 4 for b in prepped.biases)
    # TODO(synk): if hidden widths become very large (>~4K bf16 square on v7x),
    # tile the per-layer K/N contraction (reduction grid axis or
    # pltpu.emit_pipeline over weight tiles) instead of full VMEM residency.

    if tile_b is None:
        tile_b = _derive_tile_b(batch, dims_io, resident_bytes, vmem_limit)
    tile_b = max(SUBLANE, _round_up(tile_b, SUBLANE))
    batch_pad = _round_up(max(batch, tile_b), tile_b)

    # Only the batch dim is ever padded (feature dim uses the full-dim exemption).
    x_in = x if batch_pad == batch else jnp.pad(x, ((0, batch_pad - batch), (0, 0)))

    flat_args = [x_in]
    for li in range(n_layers):
        flat_args.append(prepped.weights[li])
        if use_bias:
            flat_args.append(prepped.biases[li])

    def build_in_specs(single_buffer: bool):
        specs = [pl.BlockSpec((tile_b, n_features), lambda i: (i, 0))]
        for li in range(n_layers):
            specs.append(_resident_spec(prepped.weights[li].shape, single_buffer))
            if use_bias:
                specs.append(_resident_spec(prepped.biases[li].shape, single_buffer))
        return specs

    grid = (batch_pad // tile_b,)
    out_shape = jax.ShapeDtypeStruct((batch_pad, prepped.size_z), jnp.float32)
    out_spec = pl.BlockSpec((tile_b, prepped.size_z), lambda i: (i, 0))
    kernel = functools.partial(_encoder_kernel, n_layers, use_bias)

    # Try single-buffered resident weights first; fall back to default double
    # buffering if this JAX/Mosaic build rejects pipeline_mode=Buffered(1).
    if _SINGLE_BUFFER_WEIGHTS_OK is None:
        attempts = (True, False)
    else:
        attempts = (True, False) if _SINGLE_BUFFER_WEIGHTS_OK else (False,)

    last_err = None
    for single_buffer in attempts:
        try:
            out = pl.pallas_call(
                kernel,
                out_shape=out_shape,
                grid=grid,
                in_specs=build_in_specs(single_buffer),
                out_specs=out_spec,
                compiler_params=pltpu.CompilerParams(
                    dimension_semantics=("parallel",),   # v7x: batch grid over 2 TCs
                    vmem_limit_bytes=vmem_limit,
                ),
            )(*flat_args)
            _SINGLE_BUFFER_WEIGHTS_OK = single_buffer
            return out[:batch] if batch_pad != batch else out
        except Exception as e:  # e.g. Buffered(1) unsupported -> retry default
            last_err = e
    raise last_err


def init_encoder_params(key, n_features, n_hidden_features, size_z):
    """Deterministic parameter init (shapes match the PyTorch module)."""
    dims = [n_features] + list(n_hidden_features) + [size_z]
    params = []
    for i in range(len(dims) - 1):
        key, kw, kb = jax.random.split(key, 3)
        fan_in, fan_out = dims[i], dims[i + 1]
        bound = 1.0 / jnp.sqrt(fan_in)
        w = jax.random.uniform(kw, (fan_in, fan_out), jnp.float32, -bound, bound)
        b = jax.random.uniform(kb, (fan_out,), jnp.float32, -bound, bound)
        params.append((w, b))
    return params


def encoder_reference(x, params, use_bias: bool):
    """Pure-JAX f32 reference for correctness checking."""
    h = x
    for i, (w, b) in enumerate(params):
        h = h @ w
        if use_bias:
            h = h + b
        if i < len(params) - 1:
            h = jnp.where(h > 0, h, LEAKY_SLOPE * h)
    return h


if __name__ == "__main__":
    # Small shapes consistent with the module's forward (MLP on flat features).
    # batch=48 -> tile_b=24, 2 pipelined grid steps (both TCs on v7x).
    batch = 48
    n_features = 32
    n_hidden_features = [64, 32]
    size_z = 16
    use_bias = True

    key = jax.random.PRNGKey(0)
    key, kx = jax.random.split(key)
    x = jax.random.normal(kx, (batch, n_features), jnp.float32)
    params = init_encoder_params(key, n_features, n_hidden_features, size_z)

    # One-time parameter prep (padding + bf16 cast hoisted out of the forward).
    prepped = prepare_encoder_params(params, n_features, size_z, use_bias)

    out = encoder_forward(x, prepped)
    out = jax.block_until_ready(out)

    ref = encoder_reference(x, params, use_bias)
    assert out.shape == (batch, size_z), out.shape
    # bf16 matmul operands with f32 accumulation -> compare at bf16 tolerance.
    assert jnp.allclose(out, ref, atol=3e-2, rtol=3e-2), "mismatch vs reference"

    print("KERNEL_OK")
</pallas_src>

<mosaic_0001>
module attributes {stable_mosaic.version = 11 : i64} {
  func.func @_encoder_kernel(%arg0: i32, %arg1: memref<24x32xf32, #tpu.memory_space<vmem>>, %arg2: memref<32x128xbf16, #tpu.memory_space<vmem>>, %arg3: memref<1x128xf32, #tpu.memory_space<vmem>>, %arg4: memref<128x128xbf16, #tpu.memory_space<vmem>>, %arg5: memref<1x128xf32, #tpu.memory_space<vmem>>, %arg6: memref<128x16xbf16, #tpu.memory_space<vmem>>, %arg7: memref<1x16xf32, #tpu.memory_space<vmem>>, %arg8: memref<24x16xf32, #tpu.memory_space<vmem>>) attributes {dimension_semantics = [#tpu.dimension_semantics<parallel>], iteration_bounds = array<i64: 2>, scalar_prefetch = 0 : i64, scratch_operands = 0 : i64, tpu.core_type = #tpu.core_type<tc>, window_params = [{transform_indices = @transform_0, window_bounds = array<i64: 24, 32>}, {pipeline_mode = #tpu.pipeline_mode<synchronous>, transform_indices = @transform_1, window_bounds = array<i64: 32, 128>}, {pipeline_mode = #tpu.pipeline_mode<synchronous>, transform_indices = @transform_2, window_bounds = array<i64: 1, 128>}, {pipeline_mode = #tpu.pipeline_mode<synchronous>, transform_indices = @transform_3, window_bounds = array<i64: 128, 128>}, {pipeline_mode = #tpu.pipeline_mode<synchronous>, transform_indices = @transform_4, window_bounds = array<i64: 1, 128>}, {pipeline_mode = #tpu.pipeline_mode<synchronous>, transform_indices = @transform_5, window_bounds = array<i64: 128, 16>}, {pipeline_mode = #tpu.pipeline_mode<synchronous>, transform_indices = @transform_6, window_bounds = array<i64: 1, 16>}, {transform_indices = @transform_7, window_bounds = array<i64: 24, 16>}]} {
    %c0 = arith.constant 0 : index
    %c0_0 = arith.constant 0 : index
    %0 = vector.load %arg1[%c0, %c0_0] : memref<24x32xf32, #tpu.memory_space<vmem>>, vector<24x32xf32>
    %1 = arith.truncf %0 : vector<24x32xf32> to vector<24x32xbf16>
    %c0_1 = arith.constant 0 : index
    %c0_2 = arith.constant 0 : index
    %2 = vector.load %arg2[%c0_1, %c0_2] : memref<32x128xbf16, #tpu.memory_space<vmem>>, vector<32x128xbf16>
    %cst = arith.constant dense<0.000000e+00> : vector<24x128xf32>
    %3 = tpu.matmul %1, %2, %cst {dimension_numbers = #tpu.dot_dimension_numbers<[1], [0], [0], [1], [0, 0, 1, 1], [], []>} : vector<24x32xbf16>, vector<32x128xbf16>, vector<24x128xf32> -> vector<24x128xf32>
    %c0_3 = arith.constant 0 : index
    %c0_4 = arith.constant 0 : index
    %4 = vector.load %arg3[%c0_3, %c0_4] : memref<1x128xf32, #tpu.memory_space<vmem>>, vector<1x128xf32>
    %5 = vector.broadcast %4 : vector<1x128xf32> to vector<24x128xf32>
    %6 = arith.addf %3, %5 : vector<24x128xf32>
    %cst_5 = arith.constant 0.00999999977 : f32
    %7 = vector.broadcast %cst_5 : f32 to vector<24x128xf32>
    %8 = arith.mulf %7, %6 : vector<24x128xf32>
    %9 = arith.maximumf %6, %8 : vector<24x128xf32>
    %10 = arith.truncf %9 : vector<24x128xf32> to vector<24x128xbf16>
    %c0_6 = arith.constant 0 : index
    %c0_7 = arith.constant 0 : index
    %11 = vector.load %arg4[%c0_6, %c0_7] : memref<128x128xbf16, #tpu.memory_space<vmem>>, vector<128x128xbf16>
    %cst_8 = arith.constant dense<0.000000e+00> : vector<24x128xf32>
    %12 = tpu.matmul %10, %11, %cst_8 {dimension_numbers = #tpu.dot_dimension_numbers<[1], [0], [0], [1], [0, 0, 1, 1], [], []>} : vector<24x128xbf16>, vector<128x128xbf16>, vector<24x128xf32> -> vector<24x128xf32>
    %c0_9 = arith.constant 0 : index
    %c0_10 = arith.constant 0 : index
    %13 = vector.load %arg5[%c0_9, %c0_10] : memref<1x128xf32, #tpu.memory_space<vmem>>, vector<1x128xf32>
    %14 = vector.broadcast %13 : vector<1x128xf32> to vector<24x128xf32>
    %15 = arith.addf %12, %14 : vector<24x128xf32>
    %cst_11 = arith.constant 0.00999999977 : f32
    %16 = vector.broadcast %cst_11 : f32 to vector<24x128xf32>
    %17 = arith.mulf %16, %15 : vector<24x128xf32>
    %18 = arith.maximumf %15, %17 : vector<24x128xf32>
    %19 = arith.truncf %18 : vector<24x128xf32> to vector<24x128xbf16>
    %c0_12 = arith.constant 0 : index
    %c0_13 = arith.constant 0 : index
    %20 = vector.load %arg6[%c0_12, %c0_13] : memref<128x16xbf16, #tpu.memory_space<vmem>>, vector<128x16xbf16>
    %cst_14 = arith.constant dense<0.000000e+00> : vector<24x16xf32>
    %21 = tpu.matmul %19, %20, %cst_14 {dimension_numbers = #tpu.dot_dimension_numbers<[1], [0], [0], [1], [0, 0, 1, 1], [], []>} : vector<24x128xbf16>, vector<128x16xbf16>, vector<24x16xf32> -> vector<24x16xf32>
    %c0_15 = arith.constant 0 : index
    %c0_16 = arith.constant 0 : index
    %22 = vector.load %arg7[%c0_15, %c0_16] : memref<1x16xf32, #tpu.memory_space<vmem>>, vector<1x16xf32>
    %23 = vector.broadcast %22 : vector<1x16xf32> to vector<24x16xf32>
    %24 = arith.addf %21, %23 : vector<24x16xf32>
    %c0_17 = arith.constant 0 : index
    %c0_18 = arith.constant 0 : index
    %25 = vector.load %arg8[%c0_17, %c0_18] : memref<24x16xf32, #tpu.memory_space<vmem>>, vector<24x16xf32>
    tpu.vector_store %arg8[%c0_17, %c0_18], %24 {strides = array<i32>} : memref<24x16xf32, #tpu.memory_space<vmem>>, vector<24x16xf32>,
    return
  }
  func.func @transform_0(%arg0: i32) -> (i32, i32) {
    %c0_i32 = arith.constant 0 : i32
    %c0_i32_0 = arith.constant 0 : i32
    return %arg0, %c0_i32 : i32, i32
  }
  func.func @transform_1(%arg0: i32) -> (i32, i32) {
    %c0_i32 = arith.constant 0 : i32
    %c0_i32_0 = arith.constant 0 : i32
    %c0_i32_1 = arith.constant 0 : i32
    return %c0_i32, %c0_i32_0 : i32, i32
  }
  func.func @transform_2(%arg0: i32) -> (i32, i32) {
    %c0_i32 = arith.constant 0 : i32
    %c0_i32_0 = arith.constant 0 : i32
    %c0_i32_1 = arith.constant 0 : i32
    return %c0_i32, %c0_i32_0 : i32, i32
  }
  func.func @transform_3(%arg0: i32) -> (i32, i32) {
    %c0_i32 = arith.constant 0 : i32
    %c0_i32_0 = arith.constant 0 : i32
    %c0_i32_1 = arith.constant 0 : i32
    return %c0_i32, %c0_i32_0 : i32, i32
  }
  func.func @transform_4(%arg0: i32) -> (i32, i32) {
    %c0_i32 = arith.constant 0 : i32
    %c0_i32_0 = arith.constant 0 : i32
    %c0_i32_1 = arith.constant 0 : i32
    return %c0_i32, %c0_i32_0 : i32, i32
  }
  func.func @transform_5(%arg0: i32) -> (i32, i32) {
    %c0_i32 = arith.constant 0 : i32
    %c0_i32_0 = arith.constant 0 : i32
    %c0_i32_1 = arith.constant 0 : i32
    return %c0_i32, %c0_i32_0 : i32, i32
  }
  func.func @transform_6(%arg0: i32) -> (i32, i32) {
    %c0_i32 = arith.constant 0 : i32
    %c0_i32_0 = arith.constant 0 : i32
    %c0_i32_1 = arith.constant 0 : i32
    return %c0_i32, %c0_i32_0 : i32, i32
  }
  func.func @transform_7(%arg0: i32) -> (i32, i32) {
    %c0_i32 = arith.constant 0 : i32
    %c0_i32_0 = arith.constant 0 : i32
    return %arg0, %c0_i32 : i32, i32
  }
}

module attributes {stable_mosaic.version = 11 : i64} {
  func.func @_encoder_kernel(%arg0: i32, %arg1: memref<24x32xf32, #tpu.memory_space<vmem>>, %arg2: memref<32x128xbf16, #tpu.memory_space<vmem>>, %arg3: memref<1x128xf32, #tpu.memory_space<vmem>>, %arg4: memref<128x128xbf16, #tpu.memory_space<vmem>>, %arg5: memref<1x128xf32, #tpu.memory_space<vmem>>, %arg6: memref<128x16xbf16, #tpu.memory_space<vmem>>, %arg7: memref<1x16xf32, #tpu.memory_space<vmem>>, %arg8: memref<24x16xf32, #tpu.memory_space<vmem>>) attributes {dimension_semantics = [#tpu.dimension_semantics<parallel>], iteration_bounds = array<i64: 2>, scalar_prefetch = 0 : i64, scratch_operands = 0 : i64, tpu.core_type = #tpu.core_type<tc>, window_params = [{transform_indices = @transform_0, window_bounds = array<i64: 24, 32>}, {pipeline_mode = #tpu.pipeline_mode<synchronous>, transform_indices = @transform_1, window_bounds = array<i64: 32, 128>}, {pipeline_mode = #tpu.pipeline_mode<synchronous>, transform_indices = @transform_2, window_bounds = array<i64: 1, 128>}, {pipeline_mode = #tpu.pipeline_mode<synchronous>, transform_indices = @transform_3, window_bounds = array<i64: 128, 128>}, {pipeline_mode = #tpu.pipeline_mode<synchronous>, transform_indices = @transform_4, window_bounds = array<i64: 1, 128>}, {pipeline_mode = #tpu.pipeline_mode<synchronous>, transform_indices = @transform_5, window_bounds = array<i64: 128, 16>}, {pipeline_mode = #tpu.pipeline_mode<synchronous>, transform_indices = @transform_6, window_bounds = array<i64: 1, 16>}, {transform_indices = @transform_7, window_bounds = array<i64: 24, 16>}]} {
    %c0 = arith.constant 0 : index
    %c0_0 = arith.constant 0 : index
    %0 = vector.load %arg1[%c0, %c0_0] : memref<24x32xf32, #tpu.memory_space<vmem>>, vector<24x32xf32>
    %1 = arith.truncf %0 : vector<24x32xf32> to vector<24x32xbf16>
    %c0_1 = arith.constant 0 : index
    %c0_2 = arith.constant 0 : index
    %2 = vector.load %arg2[%c0_1, %c0_2] : memref<32x128xbf16, #tpu.memory_space<vmem>>, vector<32x128xbf16>
    %cst = arith.constant dense<0.000000e+00> : vector<24x128xf32>
    %3 = tpu.matmul %1, %2, %cst {dimension_numbers = #tpu.dot_dimension_numbers<[1], [0], [0], [1], [0, 0, 1, 1], [], []>} : vector<24x32xbf16>, vector<32x128xbf16>, vector<24x128xf32> -> vector<24x128xf32>
    %c0_3 = arith.constant 0 : index
    %c0_4 = arith.constant 0 : index
    %4 = vector.load %arg3[%c0_3, %c0_4] : memref<1x128xf32, #tpu.memory_space<vmem>>, vector<1x128xf32>
    %5 = vector.broadcast %4 : vector<1x128xf32> to vector<24x128xf32>
    %6 = arith.addf %3, %5 : vector<24x128xf32>
    %cst_5 = arith.constant 0.00999999977 : f32
    %7 = vector.broadcast %cst_5 : f32 to vector<24x128xf32>
    %8 = arith.mulf %7, %6 : vector<24x128xf32>
    %9 = arith.maximumf %6, %8 : vector<24x128xf32>
    %10 = arith.truncf %9 : vector<24x128xf32> to vector<24x128xbf16>
    %c0_6 = arith.constant 0 : index
    %c0_7 = arith.constant 0 : index
    %11 = vector.load %arg4[%c0_6, %c0_7] : memref<128x128xbf16, #tpu.memory_space<vmem>>, vector<128x128xbf16>
    %cst_8 = arith.constant dense<0.000000e+00> : vector<24x128xf32>
    %12 = tpu.matmul %10, %11, %cst_8 {dimension_numbers = #tpu.dot_dimension_numbers<[1], [0], [0], [1], [0, 0, 1, 1], [], []>} : vector<24x128xbf16>, vector<128x128xbf16>, vector<24x128xf32> -> vector<24x128xf32>
    %c0_9 = arith.constant 0 : index
    %c0_10 = arith.constant 0 : index
    %13 = vector.load %arg5[%c0_9, %c0_10] : memref<1x128xf32, #tpu.memory_space<vmem>>, vector<1x128xf32>
    %14 = vector.broadcast %13 : vector<1x128xf32> to vector<24x128xf32>
    %15 = arith.addf %12, %14 : vector<24x128xf32>
    %cst_11 = arith.constant 0.00999999977 : f32
    %16 = vector.broadcast %cst_11 : f32 to vector<24x128xf32>
    %17 = arith.mulf %16, %15 : vector<24x128xf32>
    %18 = arith.maximumf %15, %17 : vector<24x128xf32>
    %19 = arith.truncf %18 : vector<24x128xf32> to vector<24x128xbf16>
    %c0_12 = arith.constant 0 : index
    %c0_13 = arith.constant 0 : index
    %20 = vector.load %arg6[%c0_12, %c0_13] : memref<128x16xbf16, #tpu.memory_space<vmem>>, vector<128x16xbf16>
    %cst_14 = arith.constant dense<0.000000e+00> : vector<24x16xf32>
    %21 = tpu.matmul %19, %20, %cst_14 {dimension_numbers = #tpu.dot_dimension_numbers<[1], [0], [0], [1], [0, 0, 1, 1], [], []>} : vector<24x128xbf16>, vector<128x16xbf16>, vector<24x16xf32> -> vector<24x16xf32>
    %c0_15 = arith.constant 0 : index
    %c0_16 = arith.constant 0 : index
    %22 = vector.load %arg7[%c0_15, %c0_16] : memref<1x16xf32, #tpu.memory_space<vmem>>, vector<1x16xf32>
    %23 = vector.broadcast %22 : vector<1x16xf32> to vector<24x16xf32>
    %24 = arith.addf %21, %23 : vector<24x16xf32>
    %c0_17 = arith.constant 0 : index
    %c0_18 = arith.constant 0 : index
    %25 = vector.load %arg8[%c0_17, %c0_18] : memref<24x16xf32, #tpu.memory_space<vmem>>, vector<24x16xf32>
    tpu.vector_store %arg8[%c0_17, %c0_18], %24 {strides = array<i32>} : memref<24x16xf32, #tpu.memory_space<vmem>>, vector<24x16xf32>,
    return
  }
  func.func @transform_0(%arg0: i32) -> (i32, i32) {
    %c0_i32 = arith.constant 0 : i32
    %c0_i32_0 = arith.constant 0 : i32
    return %arg0, %c0_i32 : i32, i32
  }
  func.func @transform_1(%arg0: i32) -> (i32, i32) {
    %c0_i32 = arith.constant 0 : i32
    %c0_i32_0 = arith.constant 0 : i32
    %c0_i32_1 = arith.constant 0 : i32
    return %c0_i32, %c0_i32_0 : i32, i32
  }
  func.func @transform_2(%arg0: i32) -> (i32, i32) {
    %c0_i32 = arith.constant 0 : i32
    %c0_i32_0 = arith.constant 0 : i32
    %c0_i32_1 = arith.constant 0 : i32
    return %c0_i32, %c0_i32_0 : i32, i32
  }
  func.func @transform_3(%arg0: i32) -> (i32, i32) {
    %c0_i32 = arith.constant 0 : i32
    %c0_i32_0 = arith.constant 0 : i32
    %c0_i32_1 = arith.constant 0 : i32
    return %c0_i32, %c0_i32_0 : i32, i32
  }
  func.func @transform_4(%arg0: i32) -> (i32, i32) {
    %c0_i32 = arith.constant 0 : i32
    %c0_i32_0 = arith.constant 0 : i32
    %c0_i32_1 = arith.constant 0 : i32
    return %c0_i32, %c0_i32_0 : i32, i32
  }
  func.func @transform_5(%arg0: i32) -> (i32, i32) {
    %c0_i32 = arith.constant 0 : i32
    %c0_i32_0 = arith.constant 0 : i32
    %c0_i32_1 = arith.constant 0 : i32
    return %c0_i32, %c0_i32_0 : i32, i32
  }
  func.func @transform_6(%arg0: i32) -> (i32, i32) {
    %c0_i32 = arith.constant 0 : i32
    %c0_i32_0 = arith.constant 0 : i32
    %c0_i32_1 = arith.constant 0 : i32
    return %c0_i32, %c0_i32_0 : i32, i32
  }
  func.func @transform_7(%arg0: i32) -> (i32, i32) {
    %c0_i32 = arith.constant 0 : i32
    %c0_i32_0 = arith.constant 0 : i32
    return %arg0, %c0_i32 : i32, i32
  }
}

</mosaic_0001>

<bundles_post_ra>
// kernel: tpu_custom_call.1
= control target key start
LH: loop header
LB: loop body
LE: loop exit
PB: predicated region body
PF: predicated region fallthrough
CT: control target
= control target key end

     0   :  { %s858_s24 = smov 0   ;;  %s945_s0 = inlined_call_operand.vmem [shape: f32[48,32], index: 0, kind: input, shape index: {}]   ;;  %s946_s1 = inlined_call_operand.vmem [shape: bf16[32,128], index: 1, kind: input, shape index: {}]   ;;  %s947_s2 = inlined_call_operand.vmem [shape: f32[1,128], index: 2, kind: input, shape index: {}]   ;;  %s948_s3 = inlined_call_operand.vmem [shape: bf16[128,128], index: 3, kind: input, shape index: {}]   ;;  %s949_s4 = inlined_call_operand.vmem [shape: f32[1,128], index: 4, kind: input, shape index: {}]   ;;  %s950_s5 = inlined_call_operand.vmem [shape: bf16[128,16], index: 5, kind: input, shape index: {}]   ;;  %s951_s6 = inlined_call_operand.vmem [shape: f32[1,16], index: 6, kind: input, shape index: {}]   ;;  %s952_s7 = inlined_call_operand.vmem [shape: f32[48,16], index: 7, kind: output, shape index: {}]  }
   0x1 LB: > { %s680_s25 = sadd.s32 4294967295, %s816_s24   ;;  %p684_p0 = scmp.ge.s32.totalorder %s816_s24, 1  ;;  %s816_s24 = sphi %s858_s24, %s17_s24  }
   0x2   : > { %p238_p1 = scmp.lt.s32.totalorder %s816_s24, 3 }
   0x4   : > { %p239_p2 = pnand %p684_p0, %p238_p1 }
   0x5   : > { %v792_v0 = vld [vmem:[%s946_s1] sm:$0xff] (!%p239_p2)   ;;  %s270_s28 = smul.u32 (!%p239_p2), 3, %s680_s25  ;;  %v793_v1 = vld [vmem:[%s946_s1 + $0x8] sm:$0xff] (!%p239_p2)   ;;  %v796_v4 = vld [vmem:[%s948_s3 + $0x10] sm:$0xff] (!%p239_p2)   ;;  %vm311_vm0 = vcmask (!%p239_p2), 261120   ;;  %vm620_vm1 = vcmask (!%p239_p2), 130048  }
   0x6   : > { %242 = sbr.rel (%p239_p2) target bundleno = 686 (0x2ae), region = 48  ;;  %736 = vmatprep.subr.bf16.mxu0 (!%p239_p2), %v792_v0  ;;  %v794_v2 = vld [vmem:[%s948_s3] sm:$0xff] (!%p239_p2)   ;;  %v795_v3 = vld [vmem:[%s948_s3 + $0x8] sm:$0xff] (!%p239_p2)   ;;  %v797_v8 = vld [vmem:[%s948_s3 + $0x18] sm:$0xff] (!%p239_p2)  }
   0x7   : > { %p271_p3 = scmp.lt.s32.totalorder (!%p239_p2), %s270_s28, 5  ;;  %737 = vmatpush3.bf16.msra.mxu0 (!%p239_p2), %v792_v0  ;;  %744 = vmatprep.subr.bf16.mxu1 (!%p239_p2), %v794_v2  ;;  %v798_v11 = vld [vmem:[%s948_s3 + $0x20] sm:$0xff] (!%p239_p2)   ;;  %v799_v12 = vld [vmem:[%s948_s3 + $0x28] sm:$0xff] (!%p239_p2)   ;;  %v800_v13 = vld [vmem:[%s948_s3 + $0x30] sm:$0xff] (!%p239_p2)  }
   0x8   : > { %738 = vmatprep.subr.bf16.mxu0 (!%p239_p2), %v793_v1  ;;  %745 = vmatpush3.bf16.msra.mxu1 (!%p239_p2), %v794_v2  ;;  %v801_v14 = vld [vmem:[%s948_s3 + $0x38] sm:$0xff] (!%p239_p2)   ;;  %v802_v15 = vld [vmem:[%s950_s5] sm:$0xff] (!%p239_p2)   ;;  %v803_v16 = vld [vmem:[%s950_s5 + $0x8] sm:$0xff] (!%p239_p2)  }
   0x9   : > { %746 = vmatprep.subr.bf16.mxu1 (!%p239_p2), %v795_v3  ;;  %v804_v17 = vld [vmem:[%s950_s5 + $0x10] sm:$0xff] (!%p239_p2)   ;;  %v805_v18 = vld [vmem:[%s950_s5 + $0x18] sm:$0xff] (!%p239_p2)   ;;  %v806_v19 = vld [vmem:[%s950_s5 + $0x20] sm:$0xff] (!%p239_p2)  }
   0xa   : > { %v687_v20 = vld [vmem:[%s947_s2] ss:$0 sm:$0xff] (!%p239_p2)  ;;  %v807_v36 = vld [vmem:[%s950_s5 + $0x28] sm:$0xff] (!%p239_p2)   ;;  %v808_v37 = vld [vmem:[%s950_s5 + $0x30] sm:$0xff] (!%p239_p2)  }
   0xb   : > { %739 = vmatpush3.bf16.msra.mxu0 (!%p239_p2), %v793_v1  ;;  %v809_v38 = vld [vmem:[%s950_s5 + $0x38] sm:$0xff] (!%p239_p2)   ;;  %v692_v39 = vld [vmem:[%s949_s4] ss:$0 sm:$0xff] (!%p239_p2) }
   0xc   : > { %747 = vmatpush3.bf16.msra.mxu1 (!%p239_p2), %v795_v3  ;;  %764 = vmatprep.subr.bf16.mxu0 (!%p239_p2), %v802_v15  ;;  %v701_v55 = vld [vmem:[%s951_s6] ss:$0 sm:$0xff] (!%p239_p2) }
   0xd   : > { %s954_s28 = smov (!%p271_p3, %s270_s28), 5  ;;  %748 = vmatprep.subr.bf16.mxu1 %v796_v4 }
   0xe   : > { %s685_s12 = sshll.u32 %s954_s28, 3 }
   0xf   : > { %s274_s17 = scalar_lea.vmem %s945_s0, %s685_s12  ;;  %s280_s11 = scalar_lea.vmem %s952_s7, %s685_s12 }
  0x10   : > { %v283_v5 = vld [vmem:[%s274_s17] sm:$0xff]  ;;  %v284_v6 = vld [vmem:[%s274_s17 + $0x8] sm:$0xff]  ;;  %v285_v7 = vld [vmem:[%s274_s17 + $0x10] sm:$0xff]  ;;  %749 = vmatpush3.bf16.msra.mxu1 %v796_v4 }
  0x11   : > { %v286_v9 = vpack.c.bf16 %v284_v6, %v283_v5  ;;  %v287_v10 = vpack.c.bf16 %v285_v7, %v285_v7  ;;  %750 = vmatprep.subr.bf16.mxu1 %v797_v8 }
  0x13   : > { %740 = vmatprep.mubr.msk.bf16.mxu0 %vm311_vm0, %v286_v9 }
  0x14   : > { %741 = vmatmul.mubr.msk.bf16.vlgmr.msra.gmra.mrb[0].mxu0 %vm311_vm0, %v287_v10  ;;  %751 = vmatpush3.bf16.msra.mxu1 %v797_v8 }
  0x15   : > { %752 = vmatprep.subr.bf16.mxu1 %v798_v11  ;;  %765 = vmatpush3.bf16.msra.mxu0 %v802_v15 }
  0x16   : > { %766 = vmatprep.subr.bf16.mxu0 %v803_v16 }
  0x18   : > { %753 = vmatpush3.bf16.msra.mxu1 %v798_v11 }
  0x19   : > { %754 = vmatprep.subr.bf16.mxu1 %v799_v12  ;;  %767 = vmatpush3.bf16.msra.mxu0 %v803_v16 }
  0x1a   : > { %768 = vmatprep.subr.bf16.mxu0 %v804_v17 }
  0x1c   : > { %755 = vmatpush3.bf16.msra.mxu1 %v799_v12 }
  0x1d   : > { %756 = vmatprep.subr.bf16.mxu1 %v800_v13  ;;  %769 = vmatpush3.bf16.msra.mxu0 %v804_v17 }
  0x1e   : > { %770 = vmatprep.subr.bf16.mxu0 %v805_v18 }
  0x20   : > { %757 = vmatpush3.bf16.msra.mxu1 %v800_v13 }
  0x21   : > { %758 = vmatprep.subr.bf16.mxu1 %v801_v14  ;;  %771 = vmatpush3.bf16.msra.mxu0 %v805_v18 }
  0x22   : > { %772 = vmatprep.subr.bf16.mxu0 %v806_v19 }
  0x24   : > { %759 = vmatpush3.bf16.msra.mxu1 %v801_v14 }
  0x25   : > { %773 = vmatpush3.bf16.msra.mxu0 %v806_v19 }
  0x26   : > { %774 = vmatprep.subr.bf16.mxu0 %v807_v36 }
  0x29   : > { %775 = vmatpush3.bf16.msra.mxu0 %v807_v36 }
  0x2a   : > { %776 = vmatprep.subr.bf16.mxu0 %v808_v37 }
  0x2d   : > { %777 = vmatpush3.bf16.msra.mxu0 %v808_v37 }
  0x2e   : > { %778 = vmatprep.subr.bf16.mxu0 %v809_v38 }
  0x31   : > { %779 = vmatpush3.bf16.msra.mxu0 %v809_v38 }
  0xe7   : > { %v742_v21 = vpop.f32.mrb[0].mxu0 }
  0xe8   : > { %v361_v22 = vadd.f32 %v742_v21, %v687_v20  ;;  %v352_v23 = vpop.f32.mrb[1].mxu0 }
  0xe9   : > { %v353_v24 = vadd.f32 %v687_v20, %v352_v23  ;;  %v743_v25 = vpop.f32.mrb[2].mxu0 }
  0xea   : > { %v368_v26 = vmul.f32 0.01, %v361_v22  ;;  %v355_v27 = vpop.f32.mrb[3].mxu0 }
  0xeb   : > { %v366_v28 = vmul.f32 0.01, %v353_v24  ;;  %v356_v29 = vadd.f32 %v687_v20, %v355_v27 }
  0xec   : > { %v371_v31 = vmax.f32 %v361_v22, %v368_v26 }
  0xed   : > { %v367_v30 = vmul.f32 0.01, %v356_v29  ;;  %v369_v32 = vmax.f32 %v353_v24, %v366_v28 }
  0xee   : > { %v373_v35 = vpack.c.bf16 %v371_v31, %v371_v31 }
  0xef   : > { %v370_v33 = vmax.f32 %v356_v29, %v367_v30 }
  0xf1   : > { %v372_v34 = vpack.c.bf16 %v370_v33, %v369_v32 }
  0xf3   : > { %760 = vmatprep.mubr.bf16.mxu1 %v372_v34 }
  0xf4   : > { %761 = vmatmul.mubr.bf16.vlgmr.msra.gmra.mrb[0].mxu1 %v373_v35 }
 0x1c7   : > { %v762_v40 = vpop.f32.mrb[0].mxu1 }
 0x1c8   : > { %v488_v41 = vadd.f32 %v762_v40, %v692_v39  ;;  %v479_v42 = vpop.f32.mrb[1].mxu1 }
 0x1c9   : > { %v480_v43 = vadd.f32 %v692_v39, %v479_v42  ;;  %v763_v44 = vpop.f32.mrb[2].mxu1 }
 0x1ca   : > { %v495_v45 = vmul.f32 0.01, %v488_v41  ;;  %v482_v46 = vpop.f32.mrb[3].mxu1 }
 0x1cb   : > { %v493_v47 = vmul.f32 0.01, %v480_v43  ;;  %v483_v48 = vadd.f32 %v692_v39, %v482_v46 }
 0x1cc   : > { %v498_v50 = vmax.f32 %v488_v41, %v495_v45 }
 0x1cd   : > { %v494_v49 = vmul.f32 0.01, %v483_v48  ;;  %v496_v51 = vmax.f32 %v480_v43, %v493_v47 }
 0x1ce   : > { %v500_v54 = vpack.c.bf16 %v498_v50, %v498_v50 }
 0x1cf   : > { %v497_v52 = vmax.f32 %v483_v48, %v494_v49 }
 0x1d1   : > { %v499_v53 = vpack.c.bf16 %v497_v52, %v496_v51 }
 0x1d3   : > { %780 = vmatprep.mubr.bf16.mxu0 %v499_v53 }
 0x1d4   : > { %781 = vmatmul.mubr.bf16.vlgmr.msra.gmra.mrb[4].mxu0 %v500_v54 }
 0x2a7   : > { %v782_v56 = vpop.f32.mrb[4].mxu0 }
 0x2a8   : > { %v615_v57 = vadd.f32 %v782_v56, %v701_v55  ;;  %v606_v58 = vpop.f32.mrb[5].mxu0 }
 0x2a9   : > { %v607_v59 = vadd.f32 %v701_v55, %v606_v58  ;;  %v783_v60 = vpop.f32.mrb[6].mxu0 }
 0x2aa   : > { %623 = vst.msk [vmem:[%s280_s11 + $0x10] sm:$0xff] %vm620_vm1, %v615_v57  ;;  %v609_v61 = vpop.f32.mrb[7].mxu0 }
 0x2ab   : > { %621 = vst.msk [vmem:[%s280_s11] sm:$0xff] %vm620_vm1, %v607_v59  ;;  %v610_v62 = vadd.f32 %v701_v55, %v609_v61 }
 0x2ad   : > { %622 = vst.msk [vmem:[%s280_s11 + $0x8] sm:$0xff] %vm620_vm1, %v610_v62 }
 0x2ae PF: > { %s17_s24 = sadd.s32 1, %s816_s24  }
 0x2af   : > { %p14_p4 = scmp.ge.s32.totalorder %s17_s24, 4  }
 0x2b1   :  { %16 = sbr.rel (!%p14_p4) target bundleno = 1 (0x1), region = 78 }

// kernel: tpu_custom_call.1
= control target key start
LH: loop header
LB: loop body
LE: loop exit
PB: predicated region body
PF: predicated region fallthrough
CT: control target
= control target key end

     0   :  { %s858_s24 = smov 0   ;;  %s945_s0 = inlined_call_operand.vmem [shape: f32[48,32], index: 0, kind: input, shape index: {}]   ;;  %s946_s1 = inlined_call_operand.vmem [shape: bf16[32,128], index: 1, kind: input, shape index: {}]   ;;  %s947_s2 = inlined_call_operand.vmem [shape: f32[1,128], index: 2, kind: input, shape index: {}]   ;;  %s948_s3 = inlined_call_operand.vmem [shape: bf16[128,128], index: 3, kind: input, shape index: {}]   ;;  %s949_s4 = inlined_call_operand.vmem [shape: f32[1,128], index: 4, kind: input, shape index: {}]   ;;  %s950_s5 = inlined_call_operand.vmem [shape: bf16[128,16], index: 5, kind: input, shape index: {}]   ;;  %s951_s6 = inlined_call_operand.vmem [shape: f32[1,16], index: 6, kind: input, shape index: {}]   ;;  %s952_s7 = inlined_call_operand.vmem [shape: f32[48,16], index: 7, kind: output, shape index: {}]  }
   0x1 LB: > { %s680_s25 = sadd.s32 4294967295, %s816_s24   ;;  %p684_p0 = scmp.ge.s32.totalorder %s816_s24, 1  ;;  %s816_s24 = sphi %s858_s24, %s17_s24  }
   0x2   : > { %p238_p1 = scmp.lt.s32.totalorder %s816_s24, 3 }
   0x4   : > { %p239_p2 = pnand %p684_p0, %p238_p1 }
   0x5   : > { %v792_v0 = vld [vmem:[%s946_s1] sm:$0xff] (!%p239_p2)   ;;  %s270_s28 = smul.u32 (!%p239_p2), 3, %s680_s25  ;;  %v793_v1 = vld [vmem:[%s946_s1 + $0x8] sm:$0xff] (!%p239_p2)   ;;  %v796_v4 = vld [vmem:[%s948_s3 + $0x10] sm:$0xff] (!%p239_p2)   ;;  %vm311_vm0 = vcmask (!%p239_p2), 261120   ;;  %vm620_vm1 = vcmask (!%p239_p2), 130048  }
   0x6   : > { %242 = sbr.rel (%p239_p2) target bundleno = 686 (0x2ae), region = 48  ;;  %736 = vmatprep.subr.bf16.mxu0 (!%p239_p2), %v792_v0  ;;  %v794_v2 = vld [vmem:[%s948_s3] sm:$0xff] (!%p239_p2)   ;;  %v795_v3 = vld [vmem:[%s948_s3 + $0x8] sm:$0xff] (!%p239_p2)   ;;  %v797_v8 = vld [vmem:[%s948_s3 + $0x18] sm:$0xff] (!%p239_p2)  }
   0x7   : > { %p271_p3 = scmp.lt.s32.totalorder (!%p239_p2), %s270_s28, 5  ;;  %737 = vmatpush3.bf16.msra.mxu0 (!%p239_p2), %v792_v0  ;;  %744 = vmatprep.subr.bf16.mxu1 (!%p239_p2), %v794_v2  ;;  %v798_v11 = vld [vmem:[%s948_s3 + $0x20] sm:$0xff] (!%p239_p2)   ;;  %v799_v12 = vld [vmem:[%s948_s3 + $0x28] sm:$0xff] (!%p239_p2)   ;;  %v800_v13 = vld [vmem:[%s948_s3 + $0x30] sm:$0xff] (!%p239_p2)  }
   0x8   : > { %738 = vmatprep.subr.bf16.mxu0 (!%p239_p2), %v793_v1  ;;  %745 = vmatpush3.bf16.msra.mxu1 (!%p239_p2), %v794_v2  ;;  %v801_v14 = vld [vmem:[%s948_s3 + $0x38] sm:$0xff] (!%p239_p2)   ;;  %v802_v15 = vld [vmem:[%s950_s5] sm:$0xff] (!%p239_p2)   ;;  %v803_v16 = vld [vmem:[%s950_s5 + $0x8] sm:$0xff] (!%p239_p2)  }
   0x9   : > { %746 = vmatprep.subr.bf16.mxu1 (!%p239_p2), %v795_v3  ;;  %v804_v17 = vld [vmem:[%s950_s5 + $0x10] sm:$0xff] (!%p239_p2)   ;;  %v805_v18 = vld [vmem:[%s950_s5 + $0x18] sm:$0xff] (!%p239_p2)   ;;  %v806_v19 = vld [vmem:[%s950_s5 + $0x20] sm:$0xff] (!%p239_p2)  }
   0xa   : > { %v687_v20 = vld [vmem:[%s947_s2] ss:$0 sm:$0xff] (!%p239_p2)  ;;  %v807_v36 = vld [vmem:[%s950_s5 + $0x28] sm:$0xff] (!%p239_p2)   ;;  %v808_v37 = vld [vmem:[%s950_s5 + $0x30] sm:$0xff] (!%p239_p2)  }
   0xb   : > { %739 = vmatpush3.bf16.msra.mxu0 (!%p239_p2), %v793_v1  ;;  %v809_v38 = vld [vmem:[%s950_s5 + $0x38] sm:$0xff] (!%p239_p2)   ;;  %v692_v39 = vld [vmem:[%s949_s4] ss:$0 sm:$0xff] (!%p239_p2) }
   0xc   : > { %747 = vmatpush3.bf16.msra.mxu1 (!%p239_p2), %v795_v3  ;;  %764 = vmatprep.subr.bf16.mxu0 (!%p239_p2), %v802_v15  ;;  %v701_v55 = vld [vmem:[%s951_s6] ss:$0 sm:$0xff] (!%p239_p2) }
   0xd   : > { %s954_s28 = smov (!%p271_p3, %s270_s28), 5  ;;  %748 = vmatprep.subr.bf16.mxu1 %v796_v4 }
   0xe   : > { %s685_s12 = sshll.u32 %s954_s28, 3 }
   0xf   : > { %s274_s17 = scalar_lea.vmem %s945_s0, %s685_s12  ;;  %s280_s11 = scalar_lea.vmem %s952_s7, %s685_s12 }
  0x10   : > { %v283_v5 = vld [vmem:[%s274_s17] sm:$0xff]  ;;  %v284_v6 = vld [vmem:[%s274_s17 + $0x8] sm:$0xff]  ;;  %v285_v7 = vld [vmem:[%s274_s17 + $0x10] sm:$0xff]  ;;  %749 = vmatpush3.bf16.msra.mxu1 %v796_v4 }
  0x11   : > { %v286_v9 = vpack.c.bf16 %v284_v6, %v283_v5  ;;  %v287_v10 = vpack.c.bf16 %v285_v7, %v285_v7  ;;  %750 = vmatprep.subr.bf16.mxu1 %v797_v8 }
  0x13   : > { %740 = vmatprep.mubr.msk.bf16.mxu0 %vm311_vm0, %v286_v9 }
  0x14   : > { %741 = vmatmul.mubr.msk.bf16.vlgmr.msra.gmra.mrb[0].mxu0 %vm311_vm0, %v287_v10  ;;  %751 = vmatpush3.bf16.msra.mxu1 %v797_v8 }
  0x15   : > { %752 = vmatprep.subr.bf16.mxu1 %v798_v11  ;;  %765 = vmatpush3.bf16.msra.mxu0 %v802_v15 }
  0x16   : > { %766 = vmatprep.subr.bf16.mxu0 %v803_v16 }
  0x18   : > { %753 = vmatpush3.bf16.msra.mxu1 %v798_v11 }
  0x19   : > { %754 = vmatprep.subr.bf16.mxu1 %v799_v12  ;;  %767 = vmatpush3.bf16.msra.mxu0 %v803_v16 }
  0x1a   : > { %768 = vmatprep.subr.bf16.mxu0 %v804_v17 }
  0x1c   : > { %755 = vmatpush3.bf16.msra.mxu1 %v799_v12 }
  0x1d   : > { %756 = vmatprep.subr.bf16.mxu1 %v800_v13  ;;  %769 = vmatpush3.bf16.msra.mxu0 %v804_v17 }
  0x1e   : > { %770 = vmatprep.subr.bf16.mxu0 %v805_v18 }
  0x20   : > { %757 = vmatpush3.bf16.msra.mxu1 %v800_v13 }
  0x21   : > { %758 = vmatprep.subr.bf16.mxu1 %v801_v14  ;;  %771 = vmatpush3.bf16.msra.mxu0 %v805_v18 }
  0x22   : > { %772 = vmatprep.subr.bf16.mxu0 %v806_v19 }
  0x24   : > { %759 = vmatpush3.bf16.msra.mxu1 %v801_v14 }
  0x25   : > { %773 = vmatpush3.bf16.msra.mxu0 %v806_v19 }
  0x26   : > { %774 = vmatprep.subr.bf16.mxu0 %v807_v36 }
  0x29   : > { %775 = vmatpush3.bf16.msra.mxu0 %v807_v36 }
  0x2a   : > { %776 = vmatprep.subr.bf16.mxu0 %v808_v37 }
  0x2d   : > { %777 = vmatpush3.bf16.msra.mxu0 %v808_v37 }
  0x2e   : > { %778 = vmatprep.subr.bf16.mxu0 %v809_v38 }
  0x31   : > { %779 = vmatpush3.bf16.msra.mxu0 %v809_v38 }
  0xe7   : > { %v742_v21 = vpop.f32.mrb[0].mxu0 }
  0xe8   : > { %v361_v22 = vadd.f32 %v742_v21, %v687_v20  ;;  %v352_v23 = vpop.f32.mrb[1].mxu0 }
  0xe9   : > { %v353_v24 = vadd.f32 %v687_v20, %v352_v23  ;;  %v743_v25 = vpop.f32.mrb[2].mxu0 }
  0xea   : > { %v368_v26 = vmul.f32 0.01, %v361_v22  ;;  %v355_v27 = vpop.f32.mrb[3].mxu0 }
  0xeb   : > { %v366_v28 = vmul.f32 0.01, %v353_v24  ;;  %v356_v29 = vadd.f32 %v687_v20, %v355_v27 }
  0xec   : > { %v371_v31 = vmax.f32 %v361_v22, %v368_v26 }
  0xed   : > { %v367_v30 = vmul.f32 0.01, %v356_v29  ;;  %v369_v32 = vmax.f32 %v353_v24, %v366_v28 }
  0xee   : > { %v373_v35 = vpack.c.bf16 %v371_v31, %v371_v31 }
  0xef   : > { %v370_v33 = vmax.f32 %v356_v29, %v367_v30 }
  0xf1   : > { %v372_v34 = vpack.c.bf16 %v370_v33, %v369_v32 }
  0xf3   : > { %760 = vmatprep.mubr.bf16.mxu1 %v372_v34 }
  0xf4   : > { %761 = vmatmul.mubr.bf16.vlgmr.msra.gmra.mrb[0].mxu1 %v373_v35 }
 0x1c7   : > { %v762_v40 = vpop.f32.mrb[0].mxu1 }
 0x1c8   : > { %v488_v41 = vadd.f32 %v762_v40, %v692_v39  ;;  %v479_v42 = vpop.f32.mrb[1].mxu1 }
 0x1c9   : > { %v480_v43 = vadd.f32 %v692_v39, %v479_v42  ;;  %v763_v44 = vpop.f32.mrb[2].mxu1 }
 0x1ca   : > { %v495_v45 = vmul.f32 0.01, %v488_v41  ;;  %v482_v46 = vpop.f32.mrb[3].mxu1 }
 0x1cb   : > { %v493_v47 = vmul.f32 0.01, %v480_v43  ;;  %v483_v48 = vadd.f32 %v692_v39, %v482_v46 }
 0x1cc   : > { %v498_v50 = vmax.f32 %v488_v41, %v495_v45 }
 0x1cd   : > { %v494_v49 = vmul.f32 0.01, %v483_v48  ;;  %v496_v51 = vmax.f32 %v480_v43, %v493_v47 }
 0x1ce   : > { %v500_v54 = vpack.c.bf16 %v498_v50, %v498_v50 }
 0x1cf   : > { %v497_v52 = vmax.f32 %v483_v48, %v494_v49 }
 0x1d1   : > { %v499_v53 = vpack.c.bf16 %v497_v52, %v496_v51 }
 0x1d3   : > { %780 = vmatprep.mubr.bf16.mxu0 %v499_v53 }
 0x1d4   : > { %781 = vmatmul.mubr.bf16.vlgmr.msra.gmra.mrb[4].mxu0 %v500_v54 }
 0x2a7   : > { %v782_v56 = vpop.f32.mrb[4].mxu0 }
 0x2a8   : > { %v615_v57 = vadd.f32 %v782_v56, %v701_v55  ;;  %v606_v58 = vpop.f32.mrb[5].mxu0 }
 0x2a9   : > { %v607_v59 = vadd.f32 %v701_v55, %v606_v58  ;;  %v783_v60 = vpop.f32.mrb[6].mxu0 }
 0x2aa   : > { %623 = vst.msk [vmem:[%s280_s11 + $0x10] sm:$0xff] %vm620_vm1, %v615_v57  ;;  %v609_v61 = vpop.f32.mrb[7].mxu0 }
 0x2ab   : > { %621 = vst.msk [vmem:[%s280_s11] sm:$0xff] %vm620_vm1, %v607_v59  ;;  %v610_v62 = vadd.f32 %v701_v55, %v609_v61 }
 0x2ad   : > { %622 = vst.msk [vmem:[%s280_s11 + $0x8] sm:$0xff] %vm620_vm1, %v610_v62 }
 0x2ae PF: > { %s17_s24 = sadd.s32 1, %s816_s24  }
 0x2af   : > { %p14_p4 = scmp.ge.s32.totalorder %s17_s24, 4  }
 0x2b1   :  { %16 = sbr.rel (!%p14_p4) target bundleno = 1 (0x1), region = 78 }

</bundles_post_ra>
